<compile_context>
chip_gen: v7x
topology: tpu7x:2x2x1
jax: 0.10.0
libtpu: 0.0.40
codegen_flags: <defaults>
</compile_context>

<pallas_src>
import functools
import math

import jax
import jax.numpy as jnp
from jax.experimental import pallas as pl
from jax.experimental.pallas import tpu as pltpu

_LANES = 128
# Minimum sublane multiple for the packed native layout of each input dtype.
_SUBLANE_MULT = {1: 32, 2: 16, 4: 8}


def _dmse_kernel(p_ref, t_ref, sse_ref, pen_ref, *,
                 tile_rows, rows, block_stride, need_mask):
    c = pl.program_id(0)   # "parallel" chunk (megacore shard on v7x)
    s = pl.program_id(1)   # reduction step within the chunk ("arbitrary")

    @pl.when(s == 0)
    def _():
        sse_ref[...] = jnp.zeros_like(sse_ref)
        pen_ref[...] = jnp.zeros_like(pen_ref)

    p = p_ref[...].astype(jnp.float32)
    t = t_ref[...].astype(jnp.float32)

    diff = p - t
    sq = diff * diff

    # Exactly relu(-sign(p) * sign(t + 1e-6)): contributes 1 iff p and
    # (t + 1e-6) have opposite non-zero signs, i.e. p*(t + 1e-6) < 0.
    # Strict '<' keeps p == 0 and the zero-padded elements at exactly 0,
    # matching sign(0) == 0 in the reference.  (Only theoretical difference:
    # f32 product underflow at |p|,|t|~1e-23, irrelevant for loss inputs.)
    pen = jnp.where(p * (t + jnp.float32(1e-6)) < 0,
                    jnp.float32(1.0), jnp.float32(0.0))

    if need_mask:
        # Logical (unclamped) block index: rows past `rows` are either the
        # ragged overhang of the last block or a fully duplicated (clamped)
        # block on the 2-chunk split; both must contribute zero.
        blk = c * block_stride + s
        row = blk * tile_rows + jax.lax.broadcasted_iota(
            jnp.int32, (tile_rows, _LANES), 0)
        valid = row < rows
        sq = jnp.where(valid, sq, jnp.float32(0.0))
        pen = jnp.where(valid, pen, jnp.float32(0.0))

    # Sublane-group reduce only (pure vreg adds, no cross-lane XLU work) into
    # the resident (8, 128) output accumulators.
    sse_ref[...] += jnp.sum(sq.reshape(-1, 8, _LANES), axis=0)
    pen_ref[...] += jnp.sum(pen.reshape(-1, 8, _LANES), axis=0)


def directional_mse_loss(prediction, target, *, lambda_penalty=1.0, tile_rows=2048):
    """Scalar loss, matching DirectionalMSELoss.forward(prediction, target)."""
    assert prediction.shape == target.shape, "prediction/target shape mismatch"
    n = int(math.prod(prediction.shape))
    assert n > 0

    sub = max(_SUBLANE_MULT.get(jnp.dtype(prediction.dtype).itemsize, 8),
              _SUBLANE_MULT.get(jnp.dtype(target.dtype).itemsize, 8))

    rows = pl.cdiv(n, _LANES)
    rows_p = pl.cdiv(rows, sub) * sub
    padded_n = rows_p * _LANES

    # Layout plumbing only: ravel/reshape are metadata ops; no dtype convert.
    p = jnp.ravel(prediction)
    t = jnp.ravel(target)
    if padded_n != n:
        # Copy only for non lane/sublane-aligned element counts; the common
        # aligned case streams the original buffers with zero extra traffic.
        p = jnp.pad(p, (0, padded_n - n))
        t = jnp.pad(t, (0, padded_n - n))
    p2 = p.reshape(rows_p, _LANES)
    t2 = t.reshape(rows_p, _LANES)

    tr = max(sub, (int(tile_rows) // sub) * sub)
    tr = min(tr, rows_p)                 # rows_p is a multiple of sub, so is tr
    steps = pl.cdiv(rows_p, tr)

    # Shard the row stream over a leading "parallel" axis so v7x's two
    # TensorCores each take half; on single-TC chips it is just a loop level.
    num_chunks = 2 if steps >= 4 else 1
    h = pl.cdiv(steps, num_chunks)

    need_mask = (steps * tr != rows_p) or (num_chunks * h != steps)

    kernel = functools.partial(
        _dmse_kernel, tile_rows=tr, rows=rows_p, block_stride=h,
        need_mask=need_mask)

    def in_map(c, s):
        # Clamp so a fully out-of-range duplicate block keeps the DMA in
        # bounds; its contribution is zeroed by the in-kernel mask.
        return (jnp.minimum(c * h + s, steps - 1), 0)

    sse_parts, pen_parts = pl.pallas_call(
        kernel,
        out_shape=(jax.ShapeDtypeStruct((num_chunks * 8, _LANES), jnp.float32),
                   jax.ShapeDtypeStruct((num_chunks * 8, _LANES), jnp.float32)),
        grid_spec=pltpu.PrefetchScalarGridSpec(
            num_scalar_prefetch=0,
            grid=(num_chunks, h),
            in_specs=[
                pl.BlockSpec((tr, _LANES), in_map),
                pl.BlockSpec((tr, _LANES), in_map),
            ],
            out_specs=[
                pl.BlockSpec((8, _LANES), lambda c, s: (c, 0)),
                pl.BlockSpec((8, _LANES), lambda c, s: (c, 0)),
            ],
        ),
        compiler_params=pltpu.CompilerParams(
            dimension_semantics=("parallel", "arbitrary"),
        ),
    )(p2, t2)

    # Tiny (<= 2 x 2048 element) final reduce + combine; negligible next to
    # the streaming kernel.
    sse = jnp.sum(sse_parts)
    dpen = jnp.sum(pen_parts)
    return (sse + jnp.float32(lambda_penalty) * dpen) / jnp.float32(n)


def _reference_loss(prediction, target, lambda_penalty=1.0):
    p = prediction.astype(jnp.float32)
    t = target.astype(jnp.float32)
    mse = jnp.mean((p - t) ** 2)
    prod = jnp.sign(p) * jnp.sign(t + 1e-6)
    dpen = jnp.mean(jnp.maximum(-prod, 0.0))
    return mse + lambda_penalty * dpen


if __name__ == "__main__":
    key = jax.random.PRNGKey(0)
    k1, k2, k3, k4, k5, k6 = jax.random.split(key, 6)

    # Case 1: typical n-to-1 regression output shape (batch, 1); exercises the
    # small, sublane-padded path.
    pred1 = jax.random.normal(k1, (64, 1), dtype=jnp.float32)
    targ1 = jax.random.normal(k2, (64, 1), dtype=jnp.float32)
    loss1 = jax.block_until_ready(
        directional_mse_loss(pred1, targ1, lambda_penalty=1.0))
    ref1 = _reference_loss(pred1, targ1, lambda_penalty=1.0)
    assert loss1.shape == ()
    assert jnp.allclose(loss1, ref1, rtol=1e-5, atol=1e-6)

    # Case 2: lane-aligned f32 input -> zero-copy wrapper path.
    pred2 = jax.random.normal(k3, (512, 96), dtype=jnp.float32)
    targ2 = jax.random.normal(k4, (512, 96), dtype=jnp.float32)
    loss2 = jax.block_until_ready(
        directional_mse_loss(pred2, targ2, lambda_penalty=0.5))
    ref2 = _reference_loss(pred2, targ2, lambda_penalty=0.5)
    assert jnp.allclose(loss2, ref2, rtol=1e-5, atol=1e-6)

    # Case 3: bf16 native-dtype streaming with a small tile -> multi-step grid,
    # ragged last block, and a fully-masked duplicate block on the 2-chunk
    # parallel split.
    pred3 = jax.random.normal(k5, (320, 128), dtype=jnp.bfloat16)
    targ3 = jax.random.normal(k6, (320, 128), dtype=jnp.bfloat16)
    loss3 = jax.block_until_ready(
        directional_mse_loss(pred3, targ3, lambda_penalty=1.0, tile_rows=48))
    ref3 = _reference_loss(pred3, targ3, lambda_penalty=1.0)
    assert jnp.allclose(loss3, ref3, rtol=1e-5, atol=1e-6)

    print("KERNEL_OK")
</pallas_src>

<mosaic_0001>
module attributes {stable_mosaic.version = 11 : i64} {
  func.func @_dmse_kernel(%arg0: i32, %arg1: i32, %arg2: memref<8x128xf32, #tpu.memory_space<vmem>>, %arg3: memref<8x128xf32, #tpu.memory_space<vmem>>, %arg4: memref<8x128xf32, #tpu.memory_space<vmem>>, %arg5: memref<8x128xf32, #tpu.memory_space<vmem>>) attributes {dimension_semantics = [#tpu.dimension_semantics<parallel>, #tpu.dimension_semantics<arbitrary>], iteration_bounds = array<i64: 1, 1>, scalar_prefetch = 0 : i64, scratch_operands = 0 : i64, tpu.core_type = #tpu.core_type<tc>, window_params = [{transform_indices = @transform_0, window_bounds = array<i64: 8, 128>}, {transform_indices = @transform_1, window_bounds = array<i64: 8, 128>}, {transform_indices = @transform_2, window_bounds = array<i64: 8, 128>}, {transform_indices = @transform_3, window_bounds = array<i64: 8, 128>}]} {
    %c0_i32 = arith.constant 0 : i32
    %0 = arith.cmpi eq, %arg1, %c0_i32 : i32
    %1 = arith.extui %0 : i1 to i32
    %c0_i32_0 = arith.constant 0 : i32
    %2 = arith.cmpi ne, %1, %c0_i32_0 : i32
    scf.if %2 {
      %cst_17 = arith.constant 0.000000e+00 : f32
      %25 = vector.broadcast %cst_17 : f32 to vector<8x128xf32>
      %c0_18 = arith.constant 0 : index
      %c0_19 = arith.constant 0 : index
      %26 = vector.load %arg4[%c0_18, %c0_19] : memref<8x128xf32, #tpu.memory_space<vmem>>, vector<8x128xf32>
      tpu.vector_store %arg4[%c0_18, %c0_19], %25 {strides = array<i32>} : memref<8x128xf32, #tpu.memory_space<vmem>>, vector<8x128xf32>,
      %cst_20 = arith.constant 0.000000e+00 : f32
      %27 = vector.broadcast %cst_20 : f32 to vector<8x128xf32>
      %c0_21 = arith.constant 0 : index
      %c0_22 = arith.constant 0 : index
      %28 = vector.load %arg5[%c0_21, %c0_22] : memref<8x128xf32, #tpu.memory_space<vmem>>, vector<8x128xf32>
      tpu.vector_store %arg5[%c0_21, %c0_22], %27 {strides = array<i32>} : memref<8x128xf32, #tpu.memory_space<vmem>>, vector<8x128xf32>,
    } else {
    }
    %c0 = arith.constant 0 : index
    %c0_1 = arith.constant 0 : index
    %3 = vector.load %arg2[%c0, %c0_1] : memref<8x128xf32, #tpu.memory_space<vmem>>, vector<8x128xf32>
    %c0_2 = arith.constant 0 : index
    %c0_3 = arith.constant 0 : index
    %4 = vector.load %arg3[%c0_2, %c0_3] : memref<8x128xf32, #tpu.memory_space<vmem>>, vector<8x128xf32>
    %5 = arith.subf %3, %4 : vector<8x128xf32>
    %6 = arith.mulf %5, %5 : vector<8x128xf32>
    %cst = arith.constant 9.99999997E-7 : f32
    %7 = vector.broadcast %cst : f32 to vector<8x128xf32>
    %8 = arith.addf %4, %7 : vector<8x128xf32>
    %9 = arith.mulf %3, %8 : vector<8x128xf32>
    %cst_4 = arith.constant 0.000000e+00 : f32
    %10 = vector.broadcast %cst_4 : f32 to vector<8x128xf32>
    %11 = arith.cmpf olt, %9, %10 : vector<8x128xf32>
    %cst_5 = arith.constant 1.000000e+00 : f32
    %cst_6 = arith.constant 0.000000e+00 : f32
    %12 = vector.broadcast %cst_5 : f32 to vector<8x128xf32>
    %13 = vector.broadcast %cst_6 : f32 to vector<8x128xf32>
    %14 = arith.select %11, %12, %13 : vector<8x128xi1>, vector<8x128xf32>
    %c0_7 = arith.constant 0 : index
    %c0_8 = arith.constant 0 : index
    %15 = vector.load %arg4[%c0_7, %c0_8] : memref<8x128xf32, #tpu.memory_space<vmem>>, vector<8x128xf32>
    %16 = vector.shape_cast %6 : vector<8x128xf32> to vector<1x8x128xf32>
    %cst_9 = arith.constant dense<0.000000e+00> : vector<8x128xf32>
    %17 = vector.multi_reduction <add>, %16, %cst_9 [0] : vector<1x8x128xf32> to vector<8x128xf32>
    %18 = arith.addf %15, %17 : vector<8x128xf32>
    %c0_10 = arith.constant 0 : index
    %c0_11 = arith.constant 0 : index
    %19 = vector.load %arg4[%c0_10, %c0_11] : memref<8x128xf32, #tpu.memory_space<vmem>>, vector<8x128xf32>
    tpu.vector_store %arg4[%c0_10, %c0_11], %18 {strides = array<i32>} : memref<8x128xf32, #tpu.memory_space<vmem>>, vector<8x128xf32>,
    %c0_12 = arith.constant 0 : index
    %c0_13 = arith.constant 0 : index
    %20 = vector.load %arg5[%c0_12, %c0_13] : memref<8x128xf32, #tpu.memory_space<vmem>>, vector<8x128xf32>
    %21 = vector.shape_cast %14 : vector<8x128xf32> to vector<1x8x128xf32>
    %cst_14 = arith.constant dense<0.000000e+00> : vector<8x128xf32>
    %22 = vector.multi_reduction <add>, %21, %cst_14 [0] : vector<1x8x128xf32> to vector<8x128xf32>
    %23 = arith.addf %20, %22 : vector<8x128xf32>
    %c0_15 = arith.constant 0 : index
    %c0_16 = arith.constant 0 : index
    %24 = vector.load %arg5[%c0_15, %c0_16] : memref<8x128xf32, #tpu.memory_space<vmem>>, vector<8x128xf32>
    tpu.vector_store %arg5[%c0_15, %c0_16], %23 {strides = array<i32>} : memref<8x128xf32, #tpu.memory_space<vmem>>, vector<8x128xf32>,
    return
  }
  func.func @transform_0(%arg0: i32, %arg1: i32) -> (i32, i32) {
    %c1_i32 = arith.constant 1 : i32
    %0 = arith.muli %arg0, %c1_i32 : i32
    %1 = arith.addi %0, %arg1 : i32
    %c0_i32 = arith.constant 0 : i32
    %2 = arith.minsi %1, %c0_i32 : i32
    %c0_i32_0 = arith.constant 0 : i32
    %c0_i32_1 = arith.constant 0 : i32
    return %2, %c0_i32_0 : i32, i32
  }
  func.func @transform_1(%arg0: i32, %arg1: i32) -> (i32, i32) {
    %c1_i32 = arith.constant 1 : i32
    %0 = arith.muli %arg0, %c1_i32 : i32
    %1 = arith.addi %0, %arg1 : i32
    %c0_i32 = arith.constant 0 : i32
    %2 = arith.minsi %1, %c0_i32 : i32
    %c0_i32_0 = arith.constant 0 : i32
    %c0_i32_1 = arith.constant 0 : i32
    return %2, %c0_i32_0 : i32, i32
  }
  func.func @transform_2(%arg0: i32, %arg1: i32) -> (i32, i32) {
    %c0_i32 = arith.constant 0 : i32
    %c0_i32_0 = arith.constant 0 : i32
    return %arg0, %c0_i32 : i32, i32
  }
  func.func @transform_3(%arg0: i32, %arg1: i32) -> (i32, i32) {
    %c0_i32 = arith.constant 0 : i32
    %c0_i32_0 = arith.constant 0 : i32
    return %arg0, %c0_i32 : i32, i32
  }
}

</mosaic_0001>

<bundles_post_ra>
// kernel: tpu_custom_call.1
= control target key start
LH: loop header
LB: loop body
LE: loop exit
PB: predicated region body
PF: predicated region fallthrough
CT: control target
= control target key end

     0   :  { %9 = vsyncpa [#allocation3], 0  ;;  %s285_s0 = inlined_call_operand.hbm [shape: f32[8,128], index: 0, kind: input, shape index: {}]   ;;  %s286_s1 = inlined_call_operand.hbm [shape: f32[8,128], index: 1, kind: input, shape index: {}]   ;;  %s287_s2 = inlined_call_operand.hbm [shape: f32[8,128], index: 2, kind: output, shape index: {0}]   ;;  %s288_s3 = inlined_call_operand.hbm [shape: f32[8,128], index: 3, kind: output, shape index: {1}]  }
   0x1   :  { %10 = vsyncpa [#allocation6], 0 }
   0x2   :  { %11 = vsyncpa [#allocation4], 0 }
   0x3   :  { %12 = vsyncpa [#allocation9], 0  ;;  %s212_s12 = smov [#allocation2]   ;;  %s213_s14 = smov [#allocation5]  }
   0x4   :  { %s24_s13 = sshll.u32 %s212_s12, 4  ;;  %s39_s15 = sshll.u32 %s213_s14, 4  ;;  %s25_s13 = int_to_ptr.vmem [resolvable:$true] %s24_s13  ;;  %s40_s15 = int_to_ptr.vmem [resolvable:$true] %s39_s15 }
   0x5   :  { %s116_s18 = scalar_lea.hbm %s285_s0, 128 }
   0x6   :  { %p117_p0 = scmp.ne.s32.totalorder %s285_s0, %s116_s18  ;;  %p120_p1 = scmp.lt.u32.totalorder %s116_s18, %s285_s0 }
   0x8   :  { %p122_p2 = pnand %p120_p1, %p117_p0 }
   0xa   :  { %125 = shalt.err (!%p122_p2)
}
   0xb   :  { %s126_s23 = scalar_lea.vmem %s25_s13, 128  ;;  %p131_p4 = scmp.lt.s32.totalorder %s25_s13, %s25_s13 }
   0xc   :  { %p127_p3 = scmp.ne.s32.totalorder %s25_s13, %s126_s23  ;;  %p132_p5 = scmp.lt.s32.totalorder %s126_s23, %s126_s23 }
   0xe   :  { %p133_p6 = por %p132_p5, %p131_p4 }
  0x10   :  { %p134_p7 = pnand %p133_p6, %p127_p3 }
  0x12   :  { %137 = shalt.err (!%p134_p7)
}
  0x13   :  { %27 = dma.hbm_to_vmem [thread:$0]  %s285_s0, 128, %s25_s13, [#allocation3]  }
  0x14   :  { %s138_s28 = scalar_lea.hbm %s286_s1, 128 }
  0x15   :  { %p139_p8 = scmp.ne.s32.totalorder %s286_s1, %s138_s28  ;;  %p142_p9 = scmp.lt.u32.totalorder %s138_s28, %s286_s1 }
  0x17   :  { %p144_p10 = pnand %p142_p9, %p139_p8 }
  0x19   :  { %147 = shalt.err (!%p144_p10)
}
  0x1a   :  { %s148_s6 = scalar_lea.vmem %s40_s15, 128  ;;  %p153_p12 = scmp.lt.s32.totalorder %s40_s15, %s40_s15 }
  0x1b   :  { %p149_p11 = scmp.ne.s32.totalorder %s40_s15, %s148_s6  ;;  %p154_p13 = scmp.lt.s32.totalorder %s148_s6, %s148_s6 }
  0x1d   :  { %p155_p0 = por %p154_p13, %p153_p12 }
  0x1f   :  { %p156_p1 = pnand %p155_p0, %p149_p11 }
  0x21   :  { %159 = shalt.err (!%p156_p1)
}
  0x22   :  { %42 = dma.hbm_to_vmem [thread:$0]  %s286_s1, 128, %s40_s15, [#allocation6]  }
  0x23   :  { %204 = dma.done.wait [#allocation3], 128  }
  0x24   :  { %205 = vsyncadd [#allocation3], 4294967168 }
  0x25   :  { %206 = dma.done.wait [#allocation6], 128  }
  0x26   :  { %207 = vsyncadd [#allocation6], 4294967168  ;;  %v61_v0 = vld [vmem:[#allocation2] sm:$0xff]  ;;  %v62_v1 = vld [vmem:[#allocation5] sm:$0xff]  ;;  %s214_s8 = smov [#allocation7]   ;;  %s215_s10 = smov [#allocation8]  }
  0x27   :  { %v65_v2 = vadd.f32 1e-06, %v62_v1  ;;  %v63_v3 = vsub.f32 %v61_v0, %v62_v1  ;;  %s83_s9 = sshll.u32 %s214_s8, 4  ;;  %s93_s11 = sshll.u32 %s215_s10, 4  ;;  %v216_v6 = vmov 0.0   ;;  %s84_s9 = int_to_ptr.vmem [resolvable:$true] %s83_s9  ;;  %s94_s11 = int_to_ptr.vmem [resolvable:$true] %s93_s11 }
  0x28   :  { %s160_s1 = scalar_lea.vmem %s84_s9, 128  ;;  %p165_p3 = scmp.lt.s32.totalorder %s84_s9, %s84_s9 }
  0x29   :  { %v66_v4 = vmul.f32 %v65_v2, %v61_v0  ;;  %v64_v5 = vmul.f32 %v63_v3, %v63_v3  ;;  %p161_p2 = scmp.ne.s32.totalorder %s84_s9, %s160_s1  ;;  %p166_p4 = scmp.lt.s32.totalorder %s160_s1, %s160_s1 }
  0x2b   :  { %vm67_vm0 = vcmp.lt.f32.partialorder %v66_v4, 0.0  ;;  %72 = vst [vmem:[#allocation7] sm:$0xff] %v64_v5  ;;  %p167_p5 = por %p166_p4, %p165_p3 }
  0x2c   :  { %v68_v7 = vsel %vm67_vm0, 1.0, %v216_v6 }
  0x2d   :  { %p168_p6 = pnand %p167_p5, %p161_p2 }
  0x2f   :  { %171 = shalt.err (!%p168_p6)
}
  0x30   :  { %s172_s14 = scalar_lea.hbm %s287_s2, 128 }
  0x31   :  { %p173_p7 = scmp.ne.s32.totalorder %s287_s2, %s172_s14  ;;  %p176_p8 = scmp.lt.u32.totalorder %s172_s14, %s287_s2 }
  0x33   :  { %p178_p9 = pnand %p176_p8, %p173_p7 }
  0x35   :  { %181 = shalt.err (!%p178_p9)
}
  0x36   :  { %86 = dma.vmem_to_hbm [thread:$0]  %s84_s9, 128, %s287_s2, [#allocation4]   ;;  %76 = vst [vmem:[#allocation8] sm:$0xff] %v68_v7 }
  0x37   :  { %s182_s21 = scalar_lea.vmem %s94_s11, 128  ;;  %p187_p11 = scmp.lt.s32.totalorder %s94_s11, %s94_s11 }
  0x38   :  { %p183_p10 = scmp.ne.s32.totalorder %s94_s11, %s182_s21  ;;  %p188_p12 = scmp.lt.s32.totalorder %s182_s21, %s182_s21 }
  0x3a   :  { %p189_p13 = por %p188_p12, %p187_p11 }
  0x3c   :  { %p190_p0 = pnand %p189_p13, %p183_p10 }
  0x3e   :  { %193 = shalt.err (!%p190_p0)
}
  0x3f   :  { %s194_s24 = scalar_lea.hbm %s288_s3, 128 }
  0x40   :  { %p195_p1 = scmp.ne.s32.totalorder %s288_s3, %s194_s24  ;;  %p198_p2 = scmp.lt.u32.totalorder %s194_s24, %s288_s3 }
  0x42   :  { %p200_p3 = pnand %p198_p2, %p195_p1 }
  0x44   :  { %203 = shalt.err (!%p200_p3)
}
  0x45   :  { %96 = dma.vmem_to_hbm [thread:$0]  %s94_s11, 128, %s288_s3, [#allocation9]  }
  0x46   :  { %208 = dma.done.wait [#allocation4], 128  }
  0x47   :  { %209 = vsyncadd [#allocation4], 4294967168 }
  0x48   :  { %210 = dma.done.wait [#allocation9], 128  }
  0x49   :  { %211 = vsyncadd [#allocation9], 4294967168 }
  0x4a   :  { %103 = vsyncpa [#allocation3], 1 }
  0x4b   :  { %104 = vsyncpa [#allocation6], 1 }
  0x4c   :  { %105 = vsyncpa [#allocation4], 1 }
  0x4d   :  { %106 = vsyncpa [#allocation9], 1 }

</bundles_post_ra>
